<compile_context>
chip_gen: v5e
topology: v5e:2x2
jax: 0.10.0
libtpu: 0.0.40
codegen_flags: <defaults>
</compile_context>

<pallas_src>
import jax
import jax.numpy as jnp
from jax.experimental import pallas as pl
from jax.experimental.pallas import tpu as pltpu


# -----------------------------------------------------------------------------
# Kernel: fused Linear (matmul + bias) over a flattened pair representation
# -----------------------------------------------------------------------------
def _pae_linear_kernel(x_ref, w_ref, b_ref, o_ref):
    # x_ref: (tm, K)   w_ref: (K, Np)   b_ref: (1, Np)   o_ref: (tm, Np)
    acc = jnp.dot(x_ref[...], w_ref[...], preferred_element_type=jnp.float32)
    o_ref[...] = (acc + b_ref[...]).astype(o_ref.dtype)


def _choose_tm(M, K, Np, in_itemsize, out_itemsize,
               desired=4096, vmem_budget=24 * 1024 * 1024):
    """Pick the largest M-tile that (a) fits the VMEM budget double-buffered,
    (b) keeps grid_m >= 2 when possible (v7x megacore), and (c) divides M
    exactly so no pad/slice HBM copies are needed."""
    per_row = 2 * (K * in_itemsize + Np * out_itemsize)   # double-buffered x + out
    tm_cap = max(8, vmem_budget // per_row)
    tm_cap = min(desired, tm_cap)
    if M >= 16:
        tm_cap = min(tm_cap, M // 2)                      # keep >= 2 grid steps
    tm_cap = max(8, (tm_cap // 8) * 8)

    # Prefer an exact divisor of M (multiple of 8) -> no padding needed.
    for tm in range(tm_cap, 7, -8):
        if M % tm == 0:
            return tm, False
    if M <= tm_cap or M < 8:
        return M, False                                   # single full-extent block
    return tm_cap, True                                   # fallback: pad M


def pae_linear(x_flat, weight_t, bias, *, out_dtype=None):
    """x_flat: (M, K), weight_t: (K, N), bias: (N,) -> (M, N) in out_dtype."""
    M, K = x_flat.shape
    Kw, N = weight_t.shape
    assert K == Kw, (K, Kw)
    out_dtype = out_dtype or x_flat.dtype

    # Lane-dense output: pad the N axis up to a multiple of 128 with zeros.
    Np = max(128, ((N + 127) // 128) * 128)
    if Np != N:
        weight_t = jnp.pad(weight_t, ((0, 0), (0, Np - N)))
        bias = jnp.pad(bias, (0, Np - N))
    bias2d = bias.reshape(1, Np).astype(jnp.float32)
    weight_t = weight_t.astype(x_flat.dtype)

    in_itemsize = jnp.dtype(x_flat.dtype).itemsize
    out_itemsize = jnp.dtype(out_dtype).itemsize
    tm, need_pad = _choose_tm(M, K, Np, in_itemsize, out_itemsize)

    if need_pad:
        grid_m = pl.cdiv(M, tm)
        Mp = grid_m * tm
        x_flat = jnp.pad(x_flat, ((0, Mp - M), (0, 0)))
    else:
        grid_m = M // tm if tm else 1
        Mp = M

    out = pl.pallas_call(
        _pae_linear_kernel,
        out_shape=jax.ShapeDtypeStruct((Mp, Np), out_dtype),
        grid_spec=pltpu.PrefetchScalarGridSpec(
            num_scalar_prefetch=0,
            grid=(grid_m,),
            in_specs=[
                pl.BlockSpec((tm, K), lambda i: (i, 0)),   # streaming pair rows
                pl.BlockSpec((K, Np), lambda i: (0, 0)),   # full weight, resident
                pl.BlockSpec((1, Np), lambda i: (0, 0)),   # bias, resident
            ],
            out_specs=pl.BlockSpec((tm, Np), lambda i: (i, 0)),
        ),
        compiler_params=pltpu.CompilerParams(
            dimension_semantics=("parallel",),
            vmem_limit_bytes=48 * 1024 * 1024,
        ),
    )(x_flat, weight_t, bias2d)

    if need_pad:
        out = out[:M]
    if Np != N:
        out = out[:, :N]
    return out


# -----------------------------------------------------------------------------
# Forward wrapper (matches PAEHead.forward)
# -----------------------------------------------------------------------------
def pae_head_forward(params, headers, representations, batch,
                     buckets_num=64, buckets_first_break=0.0,
                     buckets_last_break=31.0):
    """JAX/Pallas equivalent of PAEHead.forward.

    params: {'weight': (buckets_num, dim) torch-style, 'bias': (buckets_num,)}
    """
    assert "folding" in headers and "frames" in headers["folding"]
    x = representations["pair"]                            # (B, L, L, dim)
    B, L1, L2, D = x.shape
    assert params["weight"].shape == (buckets_num, D), (
        params["weight"].shape, (buckets_num, D))

    # Layout plumbing: lane-dense (M, K) slab; weight presented as (K, N).
    # The pair tensor is NOT upcast — it streams in its native dtype.
    x_flat = x.reshape(B * L1 * L2, D)
    weight_t = jnp.transpose(params["weight"])             # (dim, buckets_num)
    bias = params["bias"].astype(jnp.float32)

    logits = pae_linear(x_flat, weight_t, bias, out_dtype=x.dtype)
    logits = logits.reshape(B, L1, L2, buckets_num)

    # Registered buffer `buckets` (breaks) and the frames pass-through: pure
    # data plumbing, no compute to kernelize.
    breaks = jnp.linspace(buckets_first_break, buckets_last_break,
                          buckets_num - 1, dtype=jnp.float32)

    return dict(logits=logits, breaks=breaks,
                frames=headers["folding"]["frames"])


if __name__ == "__main__":
    key = jax.random.PRNGKey(0)
    B, L, dim, buckets_num = 2, 16, 32, 64

    k1, k2, k3, k4, k5 = jax.random.split(key, 5)
    pair = jax.random.normal(k1, (B, L, L, dim), dtype=jnp.float32)
    weight = jax.random.normal(k2, (buckets_num, dim), dtype=jnp.float32) * 0.05
    bias = jax.random.normal(k3, (buckets_num,), dtype=jnp.float32) * 0.05
    rotations = jax.random.normal(k4, (B, L, 3, 3), dtype=jnp.float32)
    translations = jax.random.normal(k5, (B, L, 3), dtype=jnp.float32)

    headers = {"folding": {"frames": (rotations, translations)}}
    representations = {"pair": pair}
    batch = {}
    params = {"weight": weight, "bias": bias}

    out = pae_head_forward(params, headers, representations, batch,
                           buckets_num=buckets_num)
    logits = jax.block_until_ready(out["logits"])

    # Reference check against plain-JAX nn.Linear semantics (x @ W^T + b).
    ref = jnp.einsum("blmd,nd->blmn", pair, weight) + bias
    assert logits.shape == (B, L, L, buckets_num), logits.shape
    assert bool(jnp.all(jnp.isfinite(logits)))
    assert bool(jnp.allclose(logits, ref, atol=1e-4, rtol=1e-4))
    assert out["breaks"].shape == (buckets_num - 1,)
    assert out["frames"][0].shape == (B, L, 3, 3)
    print("KERNEL_OK")
</pallas_src>

<mosaic_0001>
module attributes {stable_mosaic.version = 11 : i64} {
  func.func @_pae_linear_kernel(%arg0: i32, %arg1: memref<256x32xf32, #tpu.memory_space<vmem>>, %arg2: memref<32x128xf32, #tpu.memory_space<vmem>>, %arg3: memref<1x128xf32, #tpu.memory_space<vmem>>, %arg4: memref<256x128xf32, #tpu.memory_space<vmem>>) attributes {dimension_semantics = [#tpu.dimension_semantics<parallel>], iteration_bounds = array<i64: 2>, scalar_prefetch = 0 : i64, scratch_operands = 0 : i64, tpu.core_type = #tpu.core_type<tc>, window_params = [{transform_indices = @transform_0, window_bounds = array<i64: 256, 32>}, {pipeline_mode = #tpu.pipeline_mode<synchronous>, transform_indices = @transform_1, window_bounds = array<i64: 32, 128>}, {pipeline_mode = #tpu.pipeline_mode<synchronous>, transform_indices = @transform_2, window_bounds = array<i64: 1, 128>}, {transform_indices = @transform_3, window_bounds = array<i64: 256, 128>}]} {
    %c0 = arith.constant 0 : index
    %c0_0 = arith.constant 0 : index
    %0 = vector.load %arg1[%c0, %c0_0] : memref<256x32xf32, #tpu.memory_space<vmem>>, vector<256x32xf32>
    %c0_1 = arith.constant 0 : index
    %c0_2 = arith.constant 0 : index
    %1 = vector.load %arg2[%c0_1, %c0_2] : memref<32x128xf32, #tpu.memory_space<vmem>>, vector<32x128xf32>
    %cst = arith.constant dense<0.000000e+00> : vector<256x128xf32>
    %2 = tpu.matmul %0, %1, %cst {dimension_numbers = #tpu.dot_dimension_numbers<[1], [0], [0], [1], [0, 0, 1, 1], [], []>} : vector<256x32xf32>, vector<32x128xf32>, vector<256x128xf32> -> vector<256x128xf32>
    %c0_3 = arith.constant 0 : index
    %c0_4 = arith.constant 0 : index
    %3 = vector.load %arg3[%c0_3, %c0_4] : memref<1x128xf32, #tpu.memory_space<vmem>>, vector<1x128xf32>
    %4 = vector.broadcast %3 : vector<1x128xf32> to vector<256x128xf32>
    %5 = arith.addf %2, %4 : vector<256x128xf32>
    %c0_5 = arith.constant 0 : index
    %c0_6 = arith.constant 0 : index
    %6 = vector.load %arg4[%c0_5, %c0_6] : memref<256x128xf32, #tpu.memory_space<vmem>>, vector<256x128xf32>
    tpu.vector_store %arg4[%c0_5, %c0_6], %5 {strides = array<i32>} : memref<256x128xf32, #tpu.memory_space<vmem>>, vector<256x128xf32>,
    return
  }
  func.func @transform_0(%arg0: i32) -> (i32, i32) {
    %c0_i32 = arith.constant 0 : i32
    %c0_i32_0 = arith.constant 0 : i32
    return %arg0, %c0_i32 : i32, i32
  }
  func.func @transform_1(%arg0: i32) -> (i32, i32) {
    %c0_i32 = arith.constant 0 : i32
    %c0_i32_0 = arith.constant 0 : i32
    %c0_i32_1 = arith.constant 0 : i32
    return %c0_i32, %c0_i32_0 : i32, i32
  }
  func.func @transform_2(%arg0: i32) -> (i32, i32) {
    %c0_i32 = arith.constant 0 : i32
    %c0_i32_0 = arith.constant 0 : i32
    %c0_i32_1 = arith.constant 0 : i32
    return %c0_i32, %c0_i32_0 : i32, i32
  }
  func.func @transform_3(%arg0: i32) -> (i32, i32) {
    %c0_i32 = arith.constant 0 : i32
    %c0_i32_0 = arith.constant 0 : i32
    return %arg0, %c0_i32 : i32, i32
  }
}

</mosaic_0001>

<bundles_post_ra>
// kernel: tpu_custom_call.1
= control target key start
LH: loop header
LB: loop body
LE: loop exit
PB: predicated region body
PF: predicated region fallthrough
CT: control target
= control target key end

     0   :  { %8 = vsyncpa [#allocation3], 0  ;;  %s955_s0 = inlined_call_operand.vmem [shape: f32[512,32], index: 0, kind: input, shape index: {}]   ;;  %s956_s1 = inlined_call_operand.vmem [shape: f32[32,128], index: 1, kind: input, shape index: {}]   ;;  %s957_s2 = inlined_call_operand.vmem [shape: f32[1,128], index: 2, kind: input, shape index: {}]   ;;  %s958_s3 = inlined_call_operand.hbm [shape: f32[512,128], index: 3, kind: output, shape index: {}]  }
   0x1   :  { %10 = vsyncpa [#allocation3 + $0x1], 0  ;;  %s717_s12 = smov 0   ;;  %s719_s13 = smov 0  }
   0x2   :  { %s721_s14 = smov 0   ;;  %s723_s15 = smov 0  }
   0x3 LB: > { %s738_s16 = sadd.s32 4294967295, %s693_s15   ;;  %s532_s17 = sadd.s32 4294967294, %s693_s15   ;;  %s693_s15 = sphi %s723_s15, %s964_s15   ;;  %s689_s14 = sphi %s721_s14, %s963_s14   ;;  %s685_s13 = sphi %s719_s13, %s962_s13   ;;  %s681_s12 = sphi %s717_s12, %s961_s12  }
   0x4   : > { %s742_s18 = sadd.s32 1, %s693_s15   ;;  %s91_s19 = sadd.s32 1, %s689_s14 }
   0x5   : > { %s88_s20 = ssub.s32 %s693_s15, %s742_s18  ;;  %p101_p0 = scmp.ne.s32.totalorder %s689_s14, %s685_s13 }
   0x6   : > { %p89_p1 = scmp.eq.s32.totalorder %s88_s20, 0  ;;  %p102_p2 = scmp.eq.s32.totalorder %s738_s16, 1 }
   0x7   : > { %p107_p3 = scmp.ne.s32.totalorder %s685_s13, %s681_s12  ;;  %p108_p4 = scmp.eq.s32.totalorder %s532_s17, 1 }
   0x8   : > { %s753_s21 = scalar_select %p89_p1, %s689_s14, %s91_s19  }
   0x9   : > { %p755_p5 = por %p102_p2, %p101_p0  ;;  %p759_p6 = por %p108_p4, %p107_p3 }
   0xa   : > { %p535_p7 = scmp.ge.s32.totalorder %s693_s15, 1  ;;  %p141_p8 = scmp.lt.s32.totalorder %s693_s15, 3 }
   0xc   : > { %p142_p9 = pnand %p535_p7, %p141_p8 }
   0xd   : > { %s537_s28 = sshll.u32 (!%p142_p9), %s738_s16, 5  ;;  %s162_s10 = sand.u32 (!%p142_p9), 1, %s685_s13  }
   0xe   : > { %145 = sbr.rel (%p142_p9) target bundleno = 222 (0xde), region = 32  ;;  %p166_p10 = scmp.lt.s32.totalorder (!%p142_p9), %s537_s28, 63 }
   0xf   : > { %s536_s11 = sshll.u32 (!%p142_p9), %s162_s10, 8  ;;  %s576_s24 = sshll.u32 (!%p142_p9), %s738_s16, 8 }
  0x10   : > { %s857_s20 = scalar_lea.vmem (!%p142_p9), [#allocation2], %s536_s11  ;;  %s466_s27 = scalar_lea.hbm (!%p142_p9), %s958_s3, %s576_s24 }
  0x11   : > { %s467_s16 = sshll.u32 (!%p142_p9), %s857_s20, 4  ;;  %s455_s29 = scalar_lea.sflag (!%p142_p9), [#allocation3], %s162_s10  ;;  %s468_s16 = int_to_ptr.vmem [resolvable:$true] %s467_s16 }
  0x12   : > { %s651_s7 = scalar_lea.hbm (!%p142_p9), %s958_s3, 512 }
  0x13   : > { %v207_v0 = vld [vmem:[%s956_s1 + $0x18] sm:$0xff]  ;;  %v206_v1 = vld [vmem:[%s956_s1 + $0x10] sm:$0xff]  ;;  %v205_v2 = vld [vmem:[%s956_s1 + $0x8] sm:$0xff]  ;;  %s966_s28 = smov (!%p166_p10, %s537_s28), 63  ;;  %vm212_vm0 = vcmask 261120  }
  0x14   : > { %578 = vmatpush.msra.mxu2 %v207_v0  ;;  %579 = vmatpush.msra.mxu3 %v207_v0  ;;  %v204_v3 = vld [vmem:[%s956_s1] sm:$0xff]  ;;  %s538_s6 = sshll.u32 %s966_s28, 3  ;;  %s469_s28 = sshll.u32 %s466_s27, 4  ;;  %s470_s28 = int_to_ptr.hbm [resolvable:$true] %s469_s28 }
  0x15   : > { %321 = vmatpush.msra.mxu0 %v207_v0  ;;  %577 = vmatpush.msra.mxu1 %v207_v0  ;;  %s781_s9 = scalar_lea.vmem %s955_s0, %s538_s6  ;;  %v853_v36 = vld [vmem:[%s957_s2] ss:$0 sm:$0xff]  ;;  %s645_s30 = sshra.s32 %s470_s28, 4  ;;  %s646_s30 = int_to_ptr.hbm [resolvable:$true] %s645_s30 }
  0x16   : > { %581 = vmatpush.msra.mxu2 %v206_v1  ;;  %582 = vmatpush.msra.mxu3 %v206_v1  ;;  %v188_v4 = vld [vmem:[%s781_s9 + $0x80] sm:$0xff]  ;;  %v189_v8 = vld [vmem:[%s781_s9 + $0x88] sm:$0xff]  ;;  %v190_v12 = vld [vmem:[%s781_s9 + $0x90] sm:$0xff]  ;;  %s647_s4 = scalar_lea.hbm %s646_s30, 256  ;;  %p652_p0 = scmp.lt.s32.totalorder %s646_s30, %s958_s3 }
  0x17   : > { %322 = vmatpush.msra.mxu0 %v206_v1  ;;  %580 = vmatpush.msra.mxu1 %v206_v1  ;;  %v196_v5 = vld [vmem:[%s781_s9 + $0xc0] sm:$0xff]  ;;  %v197_v9 = vld [vmem:[%s781_s9 + $0xc8] sm:$0xff]  ;;  %v198_v13 = vld [vmem:[%s781_s9 + $0xd0] sm:$0xff]  ;;  %p648_p11 = scmp.ne.s32.totalorder %s646_s30, %s647_s4  ;;  %p653_p1 = scmp.lt.s32.totalorder %s651_s7, %s647_s4 }
  0x18   : > { %584 = vmatpush.msra.mxu2 %v205_v2  ;;  %585 = vmatpush.msra.mxu3 %v205_v2  ;;  %v172_v6 = vld [vmem:[%s781_s9] sm:$0xff]  ;;  %v173_v10 = vld [vmem:[%s781_s9 + $0x8] sm:$0xff]  ;;  %v174_v14 = vld [vmem:[%s781_s9 + $0x10] sm:$0xff] }
  0x19   : > { %323 = vmatpush.msra.mxu0 %v205_v2  ;;  %583 = vmatpush.msra.mxu1 %v205_v2  ;;  %v180_v7 = vld [vmem:[%s781_s9 + $0x40] sm:$0xff]  ;;  %v181_v11 = vld [vmem:[%s781_s9 + $0x48] sm:$0xff]  ;;  %v182_v15 = vld [vmem:[%s781_s9 + $0x50] sm:$0xff]  ;;  %p649_p12 = pnand %p648_p11, %p755_p5  ;;  %p654_p2 = por %p653_p1, %p652_p0 }
  0x1a   : > { %587 = vmatpush.msra.mxu2 %v204_v3  ;;  %588 = vmatpush.msra.mxu3 %v204_v3  ;;  %v191_v16 = vld [vmem:[%s781_s9 + $0x98] sm:$0xff]  ;;  %v192_v20 = vld [vmem:[%s781_s9 + $0xa0] sm:$0xff]  ;;  %v193_v24 = vld [vmem:[%s781_s9 + $0xa8] sm:$0xff] }
  0x1b   : > { %555 = vmatmul.msk.f32.vlgmr.msra.gmra.mxu2 %vm212_vm0, %v188_v4  ;;  %563 = vmatmul.msk.f32.vlgmr.msra.gmra.mxu3 %vm212_vm0, %v196_v5  ;;  %v199_v17 = vld [vmem:[%s781_s9 + $0xd8] sm:$0xff]  ;;  %v200_v21 = vld [vmem:[%s781_s9 + $0xe0] sm:$0xff]  ;;  %v201_v25 = vld [vmem:[%s781_s9 + $0xe8] sm:$0xff]  ;;  %p650_p13 = pneg %p649_p12 }
  0x1c   : > { %324 = vmatpush.msra.mxu0 %v204_v3  ;;  %586 = vmatpush.msra.mxu1 %v204_v3  ;;  %v175_v18 = vld [vmem:[%s781_s9 + $0x18] sm:$0xff]  ;;  %v176_v22 = vld [vmem:[%s781_s9 + $0x20] sm:$0xff]  ;;  %v177_v26 = vld [vmem:[%s781_s9 + $0x28] sm:$0xff] }
  0x1d   : > { %539 = vmatmul.msk.f32.vlgmr.msra.gmra.mxu0 %vm212_vm0, %v172_v6  ;;  %547 = vmatmul.msk.f32.vlgmr.msra.gmra.mxu1 %vm212_vm0, %v180_v7  ;;  %v183_v19 = vld [vmem:[%s781_s9 + $0x58] sm:$0xff]  ;;  %v184_v23 = vld [vmem:[%s781_s9 + $0x60] sm:$0xff]  ;;  %v185_v27 = vld [vmem:[%s781_s9 + $0x68] sm:$0xff]  ;;  %p655_p3 = pnand %p654_p2, %p650_p13 }
  0x1e   : > { %v194_v28 = vld [vmem:[%s781_s9 + $0xb0] sm:$0xff]  ;;  %v195_v32 = vld [vmem:[%s781_s9 + $0xb8] sm:$0xff] }
  0x1f   : > { %v202_v29 = vld [vmem:[%s781_s9 + $0xf0] sm:$0xff]  ;;  %v203_v33 = vld [vmem:[%s781_s9 + $0xf8] sm:$0xff] }
  0x20   : > { %v178_v30 = vld [vmem:[%s781_s9 + $0x30] sm:$0xff]  ;;  %v179_v34 = vld [vmem:[%s781_s9 + $0x38] sm:$0xff] }
  0x21   : > { %v186_v31 = vld [vmem:[%s781_s9 + $0x70] sm:$0xff]  ;;  %v187_v35 = vld [vmem:[%s781_s9 + $0x78] sm:$0xff] }
  0x23   : > { %556 = vmatmul.msk.f32.gmra.mxu2 %vm212_vm0, %v189_v8  ;;  %564 = vmatmul.msk.f32.gmra.mxu3 %vm212_vm0, %v197_v9 }
  0x25   : > { %540 = vmatmul.msk.f32.gmra.mxu0 %vm212_vm0, %v173_v10  ;;  %548 = vmatmul.msk.f32.gmra.mxu1 %vm212_vm0, %v181_v11 }
  0x2b   : > { %557 = vmatmul.msk.f32.gmra.mxu2 %vm212_vm0, %v190_v12  ;;  %565 = vmatmul.msk.f32.gmra.mxu3 %vm212_vm0, %v198_v13 }
  0x2d   : > { %541 = vmatmul.msk.f32.gmra.mxu0 %vm212_vm0, %v174_v14  ;;  %549 = vmatmul.msk.f32.gmra.mxu1 %vm212_vm0, %v182_v15 }
  0x33   : > { %558 = vmatmul.msk.f32.gmra.mxu2 %vm212_vm0, %v191_v16  ;;  %566 = vmatmul.msk.f32.gmra.mxu3 %vm212_vm0, %v199_v17 }
  0x35   : > { %542 = vmatmul.msk.f32.gmra.mxu0 %vm212_vm0, %v175_v18  ;;  %550 = vmatmul.msk.f32.gmra.mxu1 %vm212_vm0, %v183_v19 }
  0x3b   : > { %559 = vmatmul.msk.f32.gmra.mxu2 %vm212_vm0, %v192_v20  ;;  %567 = vmatmul.msk.f32.gmra.mxu3 %vm212_vm0, %v200_v21 }
  0x3d   : > { %543 = vmatmul.msk.f32.gmra.mxu0 %vm212_vm0, %v176_v22  ;;  %551 = vmatmul.msk.f32.gmra.mxu1 %vm212_vm0, %v184_v23 }
  0x43   : > { %560 = vmatmul.msk.f32.gmra.mxu2 %vm212_vm0, %v193_v24  ;;  %568 = vmatmul.msk.f32.gmra.mxu3 %vm212_vm0, %v201_v25 }
  0x45   : > { %544 = vmatmul.msk.f32.gmra.mxu0 %vm212_vm0, %v177_v26  ;;  %552 = vmatmul.msk.f32.gmra.mxu1 %vm212_vm0, %v185_v27 }
  0x4b   : > { %561 = vmatmul.msk.f32.gmra.mxu2 %vm212_vm0, %v194_v28  ;;  %569 = vmatmul.msk.f32.gmra.mxu3 %vm212_vm0, %v202_v29 }
  0x4d   : > { %545 = vmatmul.msk.f32.gmra.mxu0 %vm212_vm0, %v178_v30  ;;  %553 = vmatmul.msk.f32.gmra.mxu1 %vm212_vm0, %v186_v31 }
  0x53   : > { %562 = vmatmul.msk.f32.gmra.mxu2 %vm212_vm0, %v195_v32  ;;  %570 = vmatmul.msk.f32.gmra.mxu3 %vm212_vm0, %v203_v33 }
  0x55   : > { %546 = vmatmul.msk.f32.gmra.mxu0 %vm212_vm0, %v179_v34  ;;  %554 = vmatmul.msk.f32.gmra.mxu1 %vm212_vm0, %v187_v35 }
  0x9a   : > { %v326_v37 = vpop.f32.mrf.mxu0  ;;  %v350_v38 = vpop.f32.mrf.mxu1 }
  0x9b   : > { %v327_v39 = vadd.f32 %v853_v36, %v326_v37  ;;  %v351_v40 = vadd.f32 %v853_v36, %v350_v38 }
  0x9d   : > { %422 = vst [vmem:[%s857_s20] sm:$0xff] %v327_v39 }
  0x9e   : > { %430 = vst [vmem:[%s857_s20 + $0x40] sm:$0xff] %v351_v40  ;;  %v374_v41 = vpop.f32.mrf.mxu2  ;;  %v398_v42 = vpop.f32.mrf.mxu3 }
  0x9f   : > { %v375_v43 = vadd.f32 %v853_v36, %v374_v41  ;;  %v399_v44 = vadd.f32 %v853_v36, %v398_v42 }
  0xa1   : > { %438 = vst [vmem:[%s857_s20 + $0x80] sm:$0xff] %v375_v43 }
  0xa2   : > { %446 = vst [vmem:[%s857_s20 + $0xc0] sm:$0xff] %v399_v44  ;;  %v329_v45 = vpop.f32.mrf.mxu0  ;;  %v353_v46 = vpop.f32.mrf.mxu1 }
  0xa3   : > { %v330_v47 = vadd.f32 %v853_v36, %v329_v45  ;;  %v354_v48 = vadd.f32 %v853_v36, %v353_v46 }
  0xa5   : > { %423 = vst [vmem:[%s857_s20 + $0x8] sm:$0xff] %v330_v47 }
  0xa6   : > { %431 = vst [vmem:[%s857_s20 + $0x48] sm:$0xff] %v354_v48  ;;  %v377_v49 = vpop.f32.mrf.mxu2  ;;  %v401_v50 = vpop.f32.mrf.mxu3 }
  0xa7   : > { %v378_v51 = vadd.f32 %v853_v36, %v377_v49  ;;  %v402_v52 = vadd.f32 %v853_v36, %v401_v50 }
  0xa9   : > { %439 = vst [vmem:[%s857_s20 + $0x88] sm:$0xff] %v378_v51 }
  0xaa   : > { %447 = vst [vmem:[%s857_s20 + $0xc8] sm:$0xff] %v402_v52  ;;  %v332_v53 = vpop.f32.mrf.mxu0  ;;  %v356_v54 = vpop.f32.mrf.mxu1 }
  0xab   : > { %v333_v55 = vadd.f32 %v853_v36, %v332_v53  ;;  %v357_v56 = vadd.f32 %v853_v36, %v356_v54 }
  0xad   : > { %424 = vst [vmem:[%s857_s20 + $0x10] sm:$0xff] %v333_v55 }
  0xae   : > { %432 = vst [vmem:[%s857_s20 + $0x50] sm:$0xff] %v357_v56  ;;  %v380_v57 = vpop.f32.mrf.mxu2  ;;  %v404_v58 = vpop.f32.mrf.mxu3 }
  0xaf   : > { %v381_v59 = vadd.f32 %v853_v36, %v380_v57  ;;  %v405_v60 = vadd.f32 %v853_v36, %v404_v58 }
  0xb1   : > { %440 = vst [vmem:[%s857_s20 + $0x90] sm:$0xff] %v381_v59 }
  0xb2   : > { %448 = vst [vmem:[%s857_s20 + $0xd0] sm:$0xff] %v405_v60  ;;  %v335_v61 = vpop.f32.mrf.mxu0  ;;  %v359_v62 = vpop.f32.mrf.mxu1 }
  0xb3   : > { %v336_v63 = vadd.f32 %v853_v36, %v335_v61  ;;  %v360_v0 = vadd.f32 %v853_v36, %v359_v62 }
  0xb5   : > { %425 = vst [vmem:[%s857_s20 + $0x18] sm:$0xff] %v336_v63 }
  0xb6   : > { %433 = vst [vmem:[%s857_s20 + $0x58] sm:$0xff] %v360_v0  ;;  %v383_v1 = vpop.f32.mrf.mxu2  ;;  %v407_v2 = vpop.f32.mrf.mxu3 }
  0xb7   : > { %v384_v3 = vadd.f32 %v853_v36, %v383_v1  ;;  %v408_v4 = vadd.f32 %v853_v36, %v407_v2 }
  0xb9   : > { %441 = vst [vmem:[%s857_s20 + $0x98] sm:$0xff] %v384_v3 }
  0xba   : > { %449 = vst [vmem:[%s857_s20 + $0xd8] sm:$0xff] %v408_v4  ;;  %v338_v5 = vpop.f32.mrf.mxu0  ;;  %v362_v6 = vpop.f32.mrf.mxu1 }
  0xbb   : > { %v339_v7 = vadd.f32 %v853_v36, %v338_v5  ;;  %v363_v8 = vadd.f32 %v853_v36, %v362_v6 }
  0xbd   : > { %426 = vst [vmem:[%s857_s20 + $0x20] sm:$0xff] %v339_v7 }
  0xbe   : > { %434 = vst [vmem:[%s857_s20 + $0x60] sm:$0xff] %v363_v8  ;;  %v386_v9 = vpop.f32.mrf.mxu2  ;;  %v410_v10 = vpop.f32.mrf.mxu3 }
  0xbf   : > { %v387_v11 = vadd.f32 %v853_v36, %v386_v9  ;;  %v411_v12 = vadd.f32 %v853_v36, %v410_v10 }
  0xc1   : > { %442 = vst [vmem:[%s857_s20 + $0xa0] sm:$0xff] %v387_v11 }
  0xc2   : > { %450 = vst [vmem:[%s857_s20 + $0xe0] sm:$0xff] %v411_v12  ;;  %v341_v13 = vpop.f32.mrf.mxu0  ;;  %v365_v14 = vpop.f32.mrf.mxu1 }
  0xc3   : > { %v342_v15 = vadd.f32 %v853_v36, %v341_v13  ;;  %v366_v16 = vadd.f32 %v853_v36, %v365_v14 }
  0xc5   : > { %427 = vst [vmem:[%s857_s20 + $0x28] sm:$0xff] %v342_v15 }
  0xc6   : > { %435 = vst [vmem:[%s857_s20 + $0x68] sm:$0xff] %v366_v16  ;;  %v389_v17 = vpop.f32.mrf.mxu2  ;;  %v413_v18 = vpop.f32.mrf.mxu3 }
  0xc7   : > { %v390_v19 = vadd.f32 %v853_v36, %v389_v17  ;;  %v414_v20 = vadd.f32 %v853_v36, %v413_v18 }
  0xc9   : > { %443 = vst [vmem:[%s857_s20 + $0xa8] sm:$0xff] %v390_v19 }
  0xca   : > { %451 = vst [vmem:[%s857_s20 + $0xe8] sm:$0xff] %v414_v20  ;;  %v344_v21 = vpop.f32.mrf.mxu0  ;;  %v368_v22 = vpop.f32.mrf.mxu1 }
  0xcb   : > { %v345_v23 = vadd.f32 %v853_v36, %v344_v21  ;;  %v369_v24 = vadd.f32 %v853_v36, %v368_v22 }
  0xcd   : > { %428 = vst [vmem:[%s857_s20 + $0x30] sm:$0xff] %v345_v23 }
  0xce   : > { %436 = vst [vmem:[%s857_s20 + $0x70] sm:$0xff] %v369_v24  ;;  %v392_v25 = vpop.f32.mrf.mxu2  ;;  %v416_v26 = vpop.f32.mrf.mxu3 }
  0xcf   : > { %v393_v27 = vadd.f32 %v853_v36, %v392_v25  ;;  %v417_v28 = vadd.f32 %v853_v36, %v416_v26 }
  0xd1   : > { %444 = vst [vmem:[%s857_s20 + $0xb0] sm:$0xff] %v393_v27 }
  0xd2   : > { %452 = vst [vmem:[%s857_s20 + $0xf0] sm:$0xff] %v417_v28  ;;  %v347_v29 = vpop.f32.mrf.mxu0  ;;  %v371_v30 = vpop.f32.mrf.mxu1 }
  0xd3   : > { %v348_v31 = vadd.f32 %v853_v36, %v347_v29  ;;  %v372_v32 = vadd.f32 %v853_v36, %v371_v30 }
  0xd5   : > { %429 = vst [vmem:[%s857_s20 + $0x38] sm:$0xff] %v348_v31 }
  0xd6   : > { %437 = vst [vmem:[%s857_s20 + $0x78] sm:$0xff] %v372_v32  ;;  %v395_v33 = vpop.f32.mrf.mxu2  ;;  %v419_v34 = vpop.f32.mrf.mxu3 }
  0xd7   : > { %v396_v35 = vadd.f32 %v853_v36, %v395_v33  ;;  %v420_v37 = vadd.f32 %v853_v36, %v419_v34 }
  0xd9   : > { %445 = vst [vmem:[%s857_s20 + $0xb8] sm:$0xff] %v396_v35 }
  0xda   : > { %453 = vst [vmem:[%s857_s20 + $0xf8] sm:$0xff] %v420_v37 }
  0xdb   : > { %658 = shalt.err (!%p655_p3)
}
  0xdc   : > { %s695_s10 = smov 128   ;;  %s696_s11 = smov 8  }
  0xdd   : > { %589 = dma.vmem_to_hbm [thread:$0]  (%p755_p5), %s468_s16, 4096, %s470_s28, %s455_s29, %s695_s10, %s695_s10, %s696_s11  }
  0xde PF: > { %p595_p4 = scmp.ge.s32.totalorder %s693_s15, 2  ;;  %s484_s17 = sand.u32 1, %s681_s12  }
  0xdf   : > { %s485_s19 = scalar_lea.sflag [#allocation3], %s484_s17 }
  0xe0   : > { %p592_p7 = pnand %p595_p4, %p759_p6 }
  0xe2   : > { %p593_p8 = pneg %p592_p7 }
  0xe4   : > { %676 = dma.done.wait (%p593_p8), %s485_s19, 4096  }
  0xe5   : > { %678 = vsyncadd (%p593_p8), %s485_s19, 4294963200  ;;  %p13_p9 = scmp.ge.s32.totalorder %s742_s18, 4   ;;  %s961_s12 = smov %s685_s13 }
  0xe6   : > { %s962_s13 = smov %s689_s14  ;;  %s963_s14 = smov %s753_s21 }
  0xe7   : > { %s964_s15 = smov %s742_s18  ;;  %15 = sbr.rel (!%p13_p9) target bundleno = 3 (0x3), region = 67 }
  0xec   :  { %491 = vsyncpa [#allocation3], 1 }
  0xed   :  { %493 = vsyncpa [#allocation3 + $0x1], 1 }

</bundles_post_ra>
